<compile_context>
chip_gen: v7x
topology: tpu7x:2x2x1
jax: 0.10.0
libtpu: 0.0.40
codegen_flags: <defaults>
</compile_context>

<pallas_src>
import functools
import math

import jax
import jax.numpy as jnp
from jax.experimental import pallas as pl
from jax.experimental.pallas import tpu as pltpu


def _gain_adapt_kernel(x_ref, w_ref, b_ref, o_ref, *, scale, offset):
    # x_ref: (TB, D) input tile (any float dtype), w_ref: (1, D) f32 weights,
    # b_ref: (1,) f32 bias in SMEM, o_ref: (TB, 1) f32 output tile.
    x = x_ref[...].astype(jnp.float32)                      # (TB, D)
    w = w_ref[...]                                          # (1, D), broadcasts
    z = jnp.sum(x * w, axis=-1, keepdims=True) + b_ref[0]   # (TB, 1) logits
    # (rmax-rmin)*sigmoid(z) + rmin  ==  scale*tanh(z/2) + offset
    o_ref[...] = (scale * jnp.tanh(0.5 * z) + offset).astype(o_ref.dtype)


def _choose_batch_tile(batch, input_dim, itemsize):
    """Largest 8-aligned batch tile <= 1024 whose x tile stays ~<= 4 MiB."""
    if batch <= 1024:
        # Full-dim block: no padding needed, satisfies the (8,128) rule.
        return batch
    budget_bytes = 4 * 1024 * 1024
    tb = budget_bytes // max(1, input_dim * itemsize)
    tb = max(8, min(1024, (tb // 8) * 8))
    return int(tb)


def gain_adapting_network(x, weight, bias, range_min, range_max):
    """Forward pass. x: (B, D); weight: (1, D) (nn.Linear layout); bias: (1,)."""
    B, D = x.shape
    w = weight.reshape(1, D).astype(jnp.float32)   # (1, D), row-major; no (D,1) tile
    b = bias.reshape(1).astype(jnp.float32)        # (1,) scalar -> SMEM

    tb = _choose_batch_tile(B, D, x.dtype.itemsize)
    n_tiles = pl.cdiv(B, tb)
    b_pad = n_tiles * tb
    if b_pad != B:
        # Pad the tail tile with zeros so it never computes on garbage rows.
        x = jnp.pad(x, ((0, b_pad - B), (0, 0)))

    scale = 0.5 * (float(range_max) - float(range_min))
    offset = 0.5 * (float(range_max) + float(range_min))
    kernel = functools.partial(_gain_adapt_kernel, scale=scale, offset=offset)

    # VMEM budget: double-buffered x tile + output tile, plus weights & slack.
    x_tile_bytes = tb * D * x.dtype.itemsize
    out_tile_bytes = tb * 4
    vmem_limit = int(min(48 * 1024 * 1024,
                         max(32 * 1024 * 1024,
                             4 * (x_tile_bytes + out_tile_bytes) + (1 << 20))))

    # TODO(synk): for tiny batches (< a few hundred rows) a fused XLA matvec
    # beats pallas_call dispatch overhead; a caller-side threshold could route
    # those around this kernel.
    out = pl.pallas_call(
        kernel,
        out_shape=jax.ShapeDtypeStruct((b_pad, 1), jnp.float32),
        grid_spec=pltpu.PrefetchScalarGridSpec(
            num_scalar_prefetch=0,
            grid=(n_tiles,),
            in_specs=[
                pl.BlockSpec((tb, D), lambda i: (i, 0)),                 # x tile
                pl.BlockSpec((1, D), lambda i: (0, 0)),                  # weights
                pl.BlockSpec(memory_space=pltpu.MemorySpace.SMEM),       # bias
            ],
            out_specs=pl.BlockSpec((tb, 1), lambda i: (i, 0)),
        ),
        compiler_params=pltpu.CompilerParams(
            dimension_semantics=("parallel",),   # batch rows are independent
            vmem_limit_bytes=vmem_limit,
        ),
    )(x, w, b)

    return out[:B] if b_pad != B else out


def _reference(x, weight, bias, range_min, range_max):
    logits = x.astype(jnp.float32) @ weight.T.astype(jnp.float32) + bias
    return (range_max - range_min) * jax.nn.sigmoid(logits) + range_min


if __name__ == "__main__":
    key = jax.random.PRNGKey(0)
    k_x, k_w, k_b = jax.random.split(key, 3)

    batch, input_dim = 8, 32
    range_min, range_max = 0.1, 2.0

    # Deterministic param init mimicking PyTorch's nn.Linear default:
    # uniform(-1/sqrt(fan_in), 1/sqrt(fan_in)).
    bound = 1.0 / math.sqrt(input_dim)
    weight = jax.random.uniform(k_w, (1, input_dim), jnp.float32, -bound, bound)
    bias = jax.random.uniform(k_b, (1,), jnp.float32, -bound, bound)
    x = jax.random.normal(k_x, (batch, input_dim), jnp.float32)

    out = gain_adapting_network(x, weight, bias, range_min, range_max)
    out = jax.block_until_ready(out)

    ref = _reference(x, weight, bias, range_min, range_max)
    assert out.shape == (batch, 1), out.shape
    assert jnp.allclose(out, ref, atol=1e-4, rtol=1e-5), (out, ref)

    print("KERNEL_OK")
</pallas_src>

<mosaic_0001>
module attributes {stable_mosaic.version = 11 : i64} {
  func.func @_gain_adapt_kernel(%arg0: i32, %arg1: memref<8x32xf32, #tpu.memory_space<vmem>>, %arg2: memref<1x32xf32, #tpu.memory_space<vmem>>, %arg3: memref<1xf32, #tpu.memory_space<smem>>, %arg4: memref<8x1xf32, #tpu.memory_space<vmem>>) attributes {dimension_semantics = [#tpu.dimension_semantics<parallel>], iteration_bounds = array<i64: 1>, scalar_prefetch = 0 : i64, scratch_operands = 0 : i64, tpu.core_type = #tpu.core_type<tc>, window_params = [{transform_indices = @transform_0, window_bounds = array<i64: 8, 32>}, {pipeline_mode = #tpu.pipeline_mode<synchronous>, transform_indices = @transform_1, window_bounds = array<i64: 1, 32>}, {transform_indices = @transform_2, window_bounds = array<i64: 1>}, {transform_indices = @transform_3, window_bounds = array<i64: 8, 1>}]} {
    %c0 = arith.constant 0 : index
    %c0_0 = arith.constant 0 : index
    %0 = vector.load %arg1[%c0, %c0_0] : memref<8x32xf32, #tpu.memory_space<vmem>>, vector<8x32xf32>
    %c0_1 = arith.constant 0 : index
    %c0_2 = arith.constant 0 : index
    %1 = vector.load %arg2[%c0_1, %c0_2] : memref<1x32xf32, #tpu.memory_space<vmem>>, vector<1x32xf32>
    %2 = vector.broadcast %1 : vector<1x32xf32> to vector<8x32xf32>
    %3 = arith.mulf %0, %2 : vector<8x32xf32>
    %cst = arith.constant dense<0.000000e+00> : vector<8xf32>
    %4 = vector.multi_reduction <add>, %3, %cst [1] : vector<8x32xf32> to vector<8xf32>
    %5 = vector.shape_cast %4 : vector<8xf32> to vector<8x1xf32>
    %c0_3 = arith.constant 0 : index
    %6 = memref.load %arg3[%c0_3] : memref<1xf32, #tpu.memory_space<smem>>
    %7 = vector.broadcast %6 : f32 to vector<8x1xf32>
    %8 = arith.addf %5, %7 : vector<8x1xf32>
    %cst_4 = arith.constant 5.000000e-01 : f32
    %9 = vector.broadcast %cst_4 : f32 to vector<8x1xf32>
    %10 = arith.mulf %9, %8 : vector<8x1xf32>
    %11 = math.tanh %10 : vector<8x1xf32>
    %cst_5 = arith.constant 0.949999988 : f32
    %12 = vector.broadcast %cst_5 : f32 to vector<8x1xf32>
    %13 = arith.mulf %12, %11 : vector<8x1xf32>
    %cst_6 = arith.constant 1.050000e+00 : f32
    %14 = vector.broadcast %cst_6 : f32 to vector<8x1xf32>
    %15 = arith.addf %13, %14 : vector<8x1xf32>
    %c0_7 = arith.constant 0 : index
    %c0_8 = arith.constant 0 : index
    %16 = vector.load %arg4[%c0_7, %c0_8] : memref<8x1xf32, #tpu.memory_space<vmem>>, vector<8x1xf32>
    tpu.vector_store %arg4[%c0_7, %c0_8], %15 {strides = array<i32>} : memref<8x1xf32, #tpu.memory_space<vmem>>, vector<8x1xf32>,
    return
  }
  func.func @transform_0(%arg0: i32) -> (i32, i32) {
    %c0_i32 = arith.constant 0 : i32
    %c0_i32_0 = arith.constant 0 : i32
    return %arg0, %c0_i32 : i32, i32
  }
  func.func @transform_1(%arg0: i32) -> (i32, i32) {
    %c0_i32 = arith.constant 0 : i32
    %c0_i32_0 = arith.constant 0 : i32
    %c0_i32_1 = arith.constant 0 : i32
    return %c0_i32, %c0_i32_0 : i32, i32
  }
  func.func @transform_2(%arg0: i32) -> i32 {
    %c0_i32 = arith.constant 0 : i32
    %c0_i32_0 = arith.constant 0 : i32
    return %c0_i32 : i32
  }
  func.func @transform_3(%arg0: i32) -> (i32, i32) {
    %c0_i32 = arith.constant 0 : i32
    %c0_i32_0 = arith.constant 0 : i32
    return %arg0, %c0_i32 : i32, i32
  }
}

</mosaic_0001>

<bundles_post_ra>
// kernel: tpu_custom_call.1
= control target key start
LH: loop header
LB: loop body
LE: loop exit
PB: predicated region body
PF: predicated region fallthrough
CT: control target
= control target key end

     0   :  { %9 = vsyncpa [#allocation4], 0  ;;  %s82_s12 = smov [#allocation3]   ;;  %s124_s0 = inlined_call_operand.hbm [shape: f32[8,32], index: 0, kind: input, shape index: {}]   ;;  %s125_s1 = inlined_call_operand.vmem [shape: f32[1,32], index: 1, kind: input, shape index: {}]   ;;  %s126_s2 = inlined_call_operand.<no memory space> [shape: f32[1], index: 2, kind: input, shape index: {}]   ;;  %s127_s3 = inlined_call_operand.vmem [shape: f32[8,1], index: 3, kind: output, shape index: {}]  }
   0x1   :  { %s16_s13 = sshll.u32 %s82_s12, 4  ;;  %s58_s16 = scalar_lea.hbm %s124_s0, 128  ;;  %s17_s13 = int_to_ptr.vmem [resolvable:$true] %s16_s13 }
   0x2   :  { %p59_p0 = scmp.ne.s32.totalorder %s124_s0, %s58_s16  ;;  %p62_p1 = scmp.lt.u32.totalorder %s58_s16, %s124_s0 }
   0x4   :  { %p64_p2 = pnand %p62_p1, %p59_p0 }
   0x6   :  { %67 = shalt.err (!%p64_p2)
}
   0x7   :  { %s68_s21 = scalar_lea.vmem %s17_s13, 128  ;;  %p73_p4 = scmp.lt.s32.totalorder %s17_s13, %s17_s13 }
   0x8   :  { %p69_p3 = scmp.ne.s32.totalorder %s17_s13, %s68_s21  ;;  %p74_p5 = scmp.lt.s32.totalorder %s68_s21, %s68_s21 }
   0xa   :  { %p75_p6 = por %p74_p5, %p73_p4 }
   0xc   :  { %p76_p7 = pnand %p75_p6, %p69_p3 }
   0xe   :  { %79 = shalt.err (!%p76_p7)
}
   0xf   :  { %19 = dma.hbm_to_vmem [thread:$0]  %s124_s0, 128, %s17_s13, [#allocation4]  }
  0x10   :  { %80 = dma.done.wait [#allocation4], 128  }
  0x11   :  { %81 = vsyncadd [#allocation4], 4294967168  ;;  %v27_v0 = vld [vmem:[#allocation3] sm:$0xff]  ;;  %vm36_vm0 = vcmask 261120   ;;  %v41_v4 = vstv %s126_s2  ;;  %vm47_vm1 = vcmask 7168  }
  0x12   :  { %v54_v1 = vld [vmem:[%s125_s1] ss:$0 sm:$0xff] }
  0x13   :  { %v35_v2 = vmul.f32 %v54_v1, %v27_v0 }
  0x15   :  { %v37_v3 = vsel %vm36_vm0, %v35_v2, 0.0 }
  0x16   :  { %38 = vadd.xlane.f32.xlu0 %v37_v3 }
  0xa3   :  { %v39_v5 = vpop.xlane.xlu0 %38 }
  0xa4   :  { %v42_v6 = vadd.f32 %v41_v4, %v39_v5 }
  0xa6   :  { %v43_v7 = vmul.f32 0.5, %v42_v6 }
  0xa8   :  { %56 = vtanh.f32 %v43_v7 }
  0xb2   :  { %v57_v8 = vpop.eup %56 }
  0xb3   :  { %v45_v9 = vmul.f32 0.95, %v57_v8 }
  0xb5   :  { %v46_v10 = vadd.f32 1.05, %v45_v9 }
  0xb7   :  { %48 = vst.msk [vmem:[%s127_s3] sm:$0xff] %vm47_vm1, %v46_v10 }
  0xb8   :  { %53 = vsyncpa [#allocation4], 1 }

</bundles_post_ra>
